<compile_context>
chip_gen: v7x
topology: tpu7x:2x2x1
jax: 0.10.0
libtpu: 0.0.40
codegen_flags: <defaults>
</compile_context>

<pallas_src>
import functools

import jax
import jax.numpy as jnp
from jax.experimental import pallas as pl
from jax.experimental.pallas import tpu as pltpu


# ----------------------------------------------------------------------------
# Kernel
# ----------------------------------------------------------------------------
def _matching_sim_kernel(t_ref, s_ref, tm_ref, sm_ref, o_ref, *, compute_dtype):
    """One (batch-block, support-block) grid step.

    t_ref : (BB, SB, T, D)   test reps, original dtype
    s_ref : (BB, SB, L, D)   support reps, original dtype
    tm_ref: (BB, 1,  T, 1)   test token mask, original dtype
    sm_ref: (BB, SB, 1, L)   support token mask, original dtype
    o_ref : (BB, SB, T*L)    masked similarity, lane-dense
    """
    BB, SB, T, D = t_ref.shape
    L = s_ref.shape[2]

    # Cast in VMEM (free under the DMA shadow); HBM traffic stays at the input
    # dtype.  compute_dtype == input dtype makes this a no-op.
    t = t_ref[...].astype(compute_dtype).reshape(BB * SB, T, D)
    s = s_ref[...].astype(compute_dtype).reshape(BB * SB, L, D)

    # Batched MXU contraction with f32 accumulation.
    sim = jnp.einsum('ntd,nld->ntl', t, s,
                     preferred_element_type=jnp.float32).reshape(BB, SB, T, L)

    # Fused outer-product masking (no materialized (BB,SB,T,L) mask temp).
    masked = (sim
              * tm_ref[...].astype(jnp.float32)     # (BB, 1,  T, 1)
              * sm_ref[...].astype(jnp.float32))    # (BB, SB, 1, L)

    # Lane-dense store: collapse (T, L) into the lane axis.
    o_ref[...] = masked.reshape(BB, SB, T * L).astype(o_ref.dtype)


# ----------------------------------------------------------------------------
# Helpers
# ----------------------------------------------------------------------------
def _round_up(x, m):
    return (x + m - 1) // m * m


def _padded_tile_bytes(rows, cols, itemsize):
    """VMEM bytes of a (rows, cols) tile after (sublane, lane) padding."""
    sublane = max(8, 32 // max(itemsize, 1))     # 8 for f32, 16 for bf16, 32 for i8
    return _round_up(rows, sublane) * _round_up(cols, 128) * itemsize


def _divisors_desc(n):
    return [d for d in range(n, 0, -1) if n % d == 0]


def _vmem_capacity_bytes():
    try:
        return int(pltpu.get_tpu_info().vmem_capacity_bytes)
    except Exception:
        return 64 * 1024 * 1024   # conservative: v7x has 64 MiB per TensorCore


# ----------------------------------------------------------------------------
# Wrapper
# ----------------------------------------------------------------------------
def matching_similarity_scorer(test_reps, support_reps,
                               test_output_mask, support_output_mask,
                               support_targets=None, label_reps=None,
                               compute_dtype=None,
                               out_dtype=jnp.float32):
    """
    :param test_reps:           (B, S, T, D)
    :param support_reps:        (B, S, L, D)
    :param test_output_mask:    (B, T)     0/1 mask (any numeric dtype)
    :param support_output_mask: (B, S, L)  0/1 mask (any numeric dtype)
    :param compute_dtype: dtype fed to the MXU.  None (default) == input dtype
                          (numerically faithful to the torch f32 forward);
                          jnp.bfloat16 is an explicit opt-in.
    :param out_dtype:     output dtype (f32 default; bf16 halves the write
                          stream when T*L writes rival the rep reads).
    :return: similarity   (B, S, T, L) in out_dtype
    """
    B, S, T, D = test_reps.shape
    L = support_reps.shape[-2]
    if compute_dtype is None:
        compute_dtype = test_reps.dtype

    in_bytes = jnp.dtype(test_reps.dtype).itemsize
    cd_bytes = jnp.dtype(compute_dtype).itemsize
    out_bytes = jnp.dtype(out_dtype).itemsize
    tm_bytes = jnp.dtype(test_output_mask.dtype).itemsize
    sm_bytes = jnp.dtype(support_output_mask.dtype).itemsize

    # ---- generation-aware VMEM budget ---------------------------------------
    vmem_cap = _vmem_capacity_bytes()        # 64 MiB (v7x) / 128 MiB (v5e, v6e)
    vmem_limit = int(vmem_cap * 0.75)        # 48 MiB / 96 MiB scoped limit
    budget = int(vmem_limit * 0.85)          # headroom for compiler internals

    def vmem_estimate(bb, sb):
        # Pipelined blocks (x2 double buffering), with (sublane, lane) padding.
        in_blocks = (bb * sb * (_padded_tile_bytes(T, D, in_bytes)
                                + _padded_tile_bytes(L, D, in_bytes))
                     + bb * _padded_tile_bytes(T, 1, tm_bytes)
                     + bb * sb * _padded_tile_bytes(1, L, sm_bytes))
        out_block = bb * _padded_tile_bytes(sb, T * L, out_bytes)
        # In-kernel temporaries: compute-dtype rep copies + ~3 f32 (T,L) arrays.
        temporaries = (bb * sb * (_padded_tile_bytes(T, D, cd_bytes)
                                  + _padded_tile_bytes(L, D, cd_bytes))
                       + 3 * bb * sb * _padded_tile_bytes(T, L, 4))
        return 2 * (in_blocks + out_block) + temporaries

    # ---- block sizes ---------------------------------------------------------
    # SB must keep the lane-dense out block legal under the (8,128) rule:
    # block dims (SB, T*L) need SB == S or SB a multiple of 8.
    sb_allowed = [d for d in _divisors_desc(S) if d == S or d % 8 == 0]
    SB = next((d for d in sb_allowed if vmem_estimate(1, d) <= budget),
              sb_allowed[-1])

    # Keep at least min(4, B) grid steps on the batch axis so both v7x
    # TensorCores get work and prefetch / write-back overlap with compute.
    bb_cap = max(1, B // min(4, B))
    bb_allowed = [d for d in _divisors_desc(B) if d <= bb_cap]
    BB = next((d for d in bb_allowed if vmem_estimate(d, SB) <= budget),
              bb_allowed[-1])
    # TODO(synk): if a single (1, SB) block still exceeds the budget (very
    #             large S*T*L), additionally block the test_seq axis T.

    grid = (B // BB, S // SB)

    # ---- wrapper-side layout plumbing (reshapes only, no dtype converts) -----
    tm = test_output_mask.reshape(B, 1, T, 1)
    sm = support_output_mask.reshape(B, S, 1, L)

    kernel = functools.partial(_matching_sim_kernel, compute_dtype=compute_dtype)

    out = pl.pallas_call(
        kernel,
        out_shape=jax.ShapeDtypeStruct((B, S, T * L), out_dtype),
        grid_spec=pltpu.PrefetchScalarGridSpec(
            num_scalar_prefetch=0,
            grid=grid,
            in_specs=[
                pl.BlockSpec((BB, SB, T, D), lambda i, j: (i, j, 0, 0)),
                pl.BlockSpec((BB, SB, L, D), lambda i, j: (i, j, 0, 0)),
                # test mask depends only on the batch block -> reused across S
                pl.BlockSpec((BB, 1, T, 1), lambda i, j: (i, 0, 0, 0)),
                pl.BlockSpec((BB, SB, 1, L), lambda i, j: (i, j, 0, 0)),
            ],
            out_specs=pl.BlockSpec((BB, SB, T * L), lambda i, j: (i, j, 0)),
        ),
        compiler_params=pltpu.CompilerParams(
            dimension_semantics=("parallel", "parallel"),
            vmem_limit_bytes=vmem_limit),
    )(test_reps, support_reps, tm, sm)

    # Free metadata reshape back to the module's (B, S, T, L) output.
    return out.reshape(B, S, T, L)


# ----------------------------------------------------------------------------
# Pure-JAX reference (mirrors the torch forward)
# ----------------------------------------------------------------------------
def _reference(test_reps, support_reps, test_output_mask, support_output_mask):
    B, S, T, D = test_reps.shape
    sim = jnp.einsum('bstd,bsld->bstl', test_reps, support_reps)
    tm = jnp.broadcast_to(test_output_mask[:, None, :], (B, S, T)).astype(jnp.float32)
    sm = support_output_mask.astype(jnp.float32)
    return sim * (tm[..., :, None] * sm[..., None, :])


if __name__ == "__main__":
    key = jax.random.PRNGKey(0)
    k1, k2, k3, k4 = jax.random.split(key, 4)

    # small shapes consistent with the module's forward
    B, S, T, L, D = 2, 2, 8, 8, 32

    test_reps = jax.random.normal(k1, (B, S, T, D), dtype=jnp.float32)
    support_reps = jax.random.normal(k2, (B, S, L, D), dtype=jnp.float32)
    # 0/1 masks (pad some tail tokens)
    test_output_mask = (jax.random.uniform(k3, (B, T)) > 0.25).astype(jnp.float32)
    support_output_mask = (jax.random.uniform(k4, (B, S, L)) > 0.25).astype(jnp.float32)

    ref = _reference(test_reps, support_reps, test_output_mask, support_output_mask)

    # Default path: compute dtype == input dtype (f32), faithful numerics.
    out = matching_similarity_scorer(
        test_reps, support_reps, test_output_mask, support_output_mask)
    # Opt-in bf16 MXU feed (f32 accumulation).
    out_bf16 = matching_similarity_scorer(
        test_reps, support_reps, test_output_mask, support_output_mask,
        compute_dtype=jnp.bfloat16)
    out, out_bf16 = jax.block_until_ready((out, out_bf16))

    assert out.shape == (B, S, T, L)
    assert out_bf16.shape == (B, S, T, L)
    assert jnp.allclose(out, ref, atol=1e-4, rtol=1e-5)
    assert jnp.allclose(out_bf16, ref, atol=2e-1, rtol=5e-2)

    print("KERNEL_OK")
</pallas_src>

<mosaic_0001>
module attributes {stable_mosaic.version = 11 : i64} {
  func.func @_matching_sim_kernel(%arg0: i32, %arg1: i32, %arg2: memref<1x2x8x32xf32, #tpu.memory_space<vmem>>, %arg3: memref<1x2x8x32xf32, #tpu.memory_space<vmem>>, %arg4: memref<1x1x8x1xf32, #tpu.memory_space<vmem>>, %arg5: memref<1x2x1x8xf32, #tpu.memory_space<vmem>>, %arg6: memref<1x2x64xf32, #tpu.memory_space<vmem>>) attributes {dimension_semantics = [#tpu.dimension_semantics<parallel>, #tpu.dimension_semantics<parallel>], iteration_bounds = array<i64: 2, 1>, scalar_prefetch = 0 : i64, scratch_operands = 0 : i64, tpu.core_type = #tpu.core_type<tc>, window_params = [{transform_indices = @transform_0, window_bounds = array<i64: 1, 2, 8, 32>}, {transform_indices = @transform_1, window_bounds = array<i64: 1, 2, 8, 32>}, {transform_indices = @transform_2, window_bounds = array<i64: 1, 1, 8, 1>}, {transform_indices = @transform_3, window_bounds = array<i64: 1, 2, 1, 8>}, {transform_indices = @transform_4, window_bounds = array<i64: 1, 2, 64>}]} {
    %c0 = arith.constant 0 : index
    %c0_0 = arith.constant 0 : index
    %c0_1 = arith.constant 0 : index
    %c0_2 = arith.constant 0 : index
    %0 = vector.load %arg2[%c0, %c0_0, %c0_1, %c0_2] : memref<1x2x8x32xf32, #tpu.memory_space<vmem>>, vector<1x2x8x32xf32>
    %1 = vector.shape_cast %0 : vector<1x2x8x32xf32> to vector<2x8x32xf32>
    %c0_3 = arith.constant 0 : index
    %c0_4 = arith.constant 0 : index
    %c0_5 = arith.constant 0 : index
    %c0_6 = arith.constant 0 : index
    %2 = vector.load %arg3[%c0_3, %c0_4, %c0_5, %c0_6] : memref<1x2x8x32xf32, #tpu.memory_space<vmem>>, vector<1x2x8x32xf32>
    %3 = vector.shape_cast %2 : vector<1x2x8x32xf32> to vector<2x8x32xf32>
    "tpu.trace_start"() <{level = 10 : i32, message = "ntd,nld->ntl"}> : () -> ()
    %cst = arith.constant dense<0.000000e+00> : vector<2x8x8xf32>
    %4 = tpu.matmul %1, %3, %cst {dimension_numbers = #tpu.dot_dimension_numbers<[2], [2], [1], [1], [0, 0, 0, 1, 1, 1], [0], [0]>} : vector<2x8x32xf32>, vector<2x8x32xf32>, vector<2x8x8xf32> -> vector<2x8x8xf32>
    "tpu.trace_stop"() : () -> ()
    %5 = vector.shape_cast %4 : vector<2x8x8xf32> to vector<1x2x8x8xf32>
    %c0_7 = arith.constant 0 : index
    %c0_8 = arith.constant 0 : index
    %c0_9 = arith.constant 0 : index
    %c0_10 = arith.constant 0 : index
    %6 = vector.load %arg4[%c0_7, %c0_8, %c0_9, %c0_10] : memref<1x1x8x1xf32, #tpu.memory_space<vmem>>, vector<1x1x8x1xf32>
    %7 = vector.broadcast %6 : vector<1x1x8x1xf32> to vector<1x2x8x8xf32>
    %8 = arith.mulf %5, %7 : vector<1x2x8x8xf32>
    %c0_11 = arith.constant 0 : index
    %c0_12 = arith.constant 0 : index
    %c0_13 = arith.constant 0 : index
    %c0_14 = arith.constant 0 : index
    %9 = vector.load %arg5[%c0_11, %c0_12, %c0_13, %c0_14] : memref<1x2x1x8xf32, #tpu.memory_space<vmem>>, vector<1x2x1x8xf32>
    %10 = vector.broadcast %9 : vector<1x2x1x8xf32> to vector<1x2x8x8xf32>
    %11 = arith.mulf %8, %10 : vector<1x2x8x8xf32>
    %12 = vector.shape_cast %11 : vector<1x2x8x8xf32> to vector<1x2x64xf32>
    %c0_15 = arith.constant 0 : index
    %c0_16 = arith.constant 0 : index
    %c0_17 = arith.constant 0 : index
    %13 = vector.load %arg6[%c0_15, %c0_16, %c0_17] : memref<1x2x64xf32, #tpu.memory_space<vmem>>, vector<1x2x64xf32>
    tpu.vector_store %arg6[%c0_15, %c0_16, %c0_17], %12 {strides = array<i32>} : memref<1x2x64xf32, #tpu.memory_space<vmem>>, vector<1x2x64xf32>,
    return
  }
  func.func @transform_0(%arg0: i32, %arg1: i32) -> (i32, i32, i32, i32) {
    %c0_i32 = arith.constant 0 : i32
    %c0_i32_0 = arith.constant 0 : i32
    %c0_i32_1 = arith.constant 0 : i32
    return %arg0, %arg1, %c0_i32, %c0_i32_0 : i32, i32, i32, i32
  }
  func.func @transform_1(%arg0: i32, %arg1: i32) -> (i32, i32, i32, i32) {
    %c0_i32 = arith.constant 0 : i32
    %c0_i32_0 = arith.constant 0 : i32
    %c0_i32_1 = arith.constant 0 : i32
    return %arg0, %arg1, %c0_i32, %c0_i32_0 : i32, i32, i32, i32
  }
  func.func @transform_2(%arg0: i32, %arg1: i32) -> (i32, i32, i32, i32) {
    %c0_i32 = arith.constant 0 : i32
    %c0_i32_0 = arith.constant 0 : i32
    %c0_i32_1 = arith.constant 0 : i32
    %c0_i32_2 = arith.constant 0 : i32
    return %arg0, %c0_i32, %c0_i32_0, %c0_i32_1 : i32, i32, i32, i32
  }
  func.func @transform_3(%arg0: i32, %arg1: i32) -> (i32, i32, i32, i32) {
    %c0_i32 = arith.constant 0 : i32
    %c0_i32_0 = arith.constant 0 : i32
    %c0_i32_1 = arith.constant 0 : i32
    return %arg0, %arg1, %c0_i32, %c0_i32_0 : i32, i32, i32, i32
  }
  func.func @transform_4(%arg0: i32, %arg1: i32) -> (i32, i32, i32) {
    %c0_i32 = arith.constant 0 : i32
    %c0_i32_0 = arith.constant 0 : i32
    return %arg0, %arg1, %c0_i32 : i32, i32, i32
  }
}

</mosaic_0001>

<bundles_post_ra>
// kernel: tpu_custom_call.1
= control target key start
LH: loop header
LB: loop body
LE: loop exit
PB: predicated region body
PF: predicated region fallthrough
CT: control target
= control target key end

     0   :  { %9 = vsyncpa [#allocation3], 0  ;;  %s1342_s0 = inlined_call_operand.hbm [shape: f32[2,2,8,32], index: 0, kind: input, shape index: {}]   ;;  %s1343_s1 = inlined_call_operand.hbm [shape: f32[2,2,8,32], index: 1, kind: input, shape index: {}]   ;;  %s1344_s2 = inlined_call_operand.vmem [shape: f32[2,1,8,1], index: 2, kind: input, shape index: {}]   ;;  %s1345_s3 = inlined_call_operand.vmem [shape: f32[2,2,1,8], index: 3, kind: input, shape index: {}]   ;;  %s1346_s4 = inlined_call_operand.hbm [shape: f32[2,2,64], index: 4, kind: output, shape index: {}]  }
   0x1   :  { %11 = vsyncpa [#allocation3 + $0x1], 0 }
   0x2   :  { %12 = vsyncpa [#allocation6], 0 }
   0x3   :  { %14 = vsyncpa [#allocation6 + $0x1], 0 }
   0x4   :  { %15 = vsyncpa [#allocation4], 0 }
   0x5   :  { %17 = vsyncpa [#allocation4 + $0x1], 0  ;;  %s1084_s15 = smov 0   ;;  %s1086_s16 = smov 0  }
   0x6   :  { %s1088_s17 = smov 0   ;;  %s1090_s18 = smov 0  }
   0x7   :  { %s1092_s19 = smov 0   ;;  %s1094_s20 = smov 0  }
   0x8 LB: > { %s770_s21 = sadd.s32 4294967295, %s1040_s20   ;;  %s771_s22 = sadd.s32 4294967294, %s1040_s20   ;;  %s1040_s20 = sphi %s1094_s20, %s23_s20   ;;  %s1036_s19 = sphi %s1092_s19, %s1366_s19   ;;  %s1032_s18 = sphi %s1090_s18, %s1365_s18   ;;  %s1028_s17 = sphi %s1088_s17, %s1364_s17   ;;  %s1024_s16 = sphi %s1086_s16, %s1363_s16   ;;  %s1020_s15 = sphi %s1084_s15, %s1362_s15  }
   0x9   : > { %s35_s23 = sadd.s32 1, %s1036_s19  ;;  %s44_s24 = sadd.s32 1, %s1028_s17 }
   0xa   : > { %p37_p0 = scmp.ge.s32.totalorder %s35_s23, 2  ;;  %p51_p1 = scmp.ne.s32.totalorder %s1028_s17, %s1024_s16 }
   0xb   : > { %p52_p2 = scmp.eq.s32.totalorder %s1040_s20, 0  ;;  %p57_p3 = scmp.ne.s32.totalorder %s1024_s16, %s1020_s15 }
   0xc   : > { %s1368_s23 = smov (%p37_p0, %s35_s23), 0  ;;  %p58_p5 = scmp.eq.s32.totalorder %s770_s21, 0 }
   0xd   : > { %p1125_p4 = por %p52_p2, %p51_p1  ;;  %s39_s26 = ssub.s32 %s1036_s19, %s1368_s23 }
   0xe   : > { %p165_p6 = scmp.eq.s32.totalorder %s770_s21, 1  ;;  %p42_p7 = scmp.eq.s32.totalorder %s39_s26, 0 }
   0xf   : > { %p1131_p8 = por %p58_p5, %p57_p3  ;;  %p171_p10 = scmp.eq.s32.totalorder %s771_s22, 1 }
  0x10   : > { %p1135_p9 = por %p165_p6, %p51_p1  ;;  %p829_p13 = scmp.lt.s32.totalorder %s1040_s20, 2 }
  0x11   : > { %s1351_s27 = scalar_select %p1131_p8, 1, 0 }
  0x12   : > { %s1352_s28 = scalar_select %p1135_p9, 1, 0 }
  0x13   : > { %s1140_s29 = scalar_select %p42_p7, %s1028_s17, %s44_s24  }
  0x14   : > { %p1142_p11 = por %p171_p10, %p57_p3  ;;  %s1149_s5 = sand.u32 1, %s1028_s17  }
  0x15   : > { %s774_s6 = sshll.u32 %s1149_s5, 4  ;;  %s796_s7 = sshll.u32 %s1036_s19, 8 }
  0x16   : > { %s1353_s30 = scalar_select %p1142_p11, 1, 0 }
  0x17   : > { %s1158_s10 = scalar_lea.hbm %s1342_s0, %s796_s7  ;;  %s195_s11 = scalar_lea.vmem [#allocation2], %s774_s6 }
  0x18   : > { %s204_s12 = sshll.u32 %s195_s11, 4  ;;  %p1166_p0 = pnand %p829_p13, %p1125_p4  ;;  %s1162_s12 = int_to_ptr.vmem [resolvable:$true] %s204_s12 }
  0x19   : > { %s192_s14 = scalar_lea.sflag [#allocation3], %s1149_s5  ;;  %s894_s21 = scalar_lea.hbm %s1158_s10, 256 }
  0x1a   : > { %p895_p2 = scmp.ne.s32.totalorder %s1158_s10, %s894_s21  ;;  %p896_p3 = pneg %p1166_p0 }
  0x1b   : > { %s899_s25 = scalar_lea.hbm %s1342_s0, 512  ;;  %p900_p4 = scmp.lt.u32.totalorder %s1158_s10, %s1342_s0 }
  0x1c   : > { %p897_p5 = pnand %p896_p3, %p895_p2  ;;  %p901_p7 = scmp.lt.u32.totalorder %s899_s25, %s894_s21 }
  0x1d   : > { %p903_p13 = scmp.lt.u32.totalorder %s894_s21, %s1158_s10 }
  0x1e   : > { %p898_p6 = pneg %p897_p5  ;;  %p902_p10 = por %p901_p7, %p900_p4 }
  0x20   : > { %p904_p12 = por %p903_p13, %p902_p10 }
  0x22   : > { %p905_p1 = pnand %p904_p12, %p898_p6 }
  0x24   : > { %908 = shalt.err (!%p905_p1)
}
  0x25   : > { %s909_s9 = scalar_lea.vmem %s1162_s12, 256  ;;  %s1042_s11 = smov [#allocation2]  }
  0x26   : > { %p910_p2 = scmp.ne.s32.totalorder %s1162_s12, %s909_s9  ;;  %s914_s22 = sshll.u32 %s1042_s11, 4  ;;  %s915_s22 = int_to_ptr.vmem [resolvable:$false] %s914_s22 }
  0x27   : > { %s916_s24 = scalar_lea.vmem %s915_s22, 512  ;;  %p917_p9 = scmp.lt.s32.totalorder %s1162_s12, %s915_s22 }
  0x28   : > { %p912_p5 = pnand %p910_p2, %p896_p3  ;;  %p918_p4 = scmp.lt.s32.totalorder %s916_s24, %s909_s9 }
  0x2a   : > { %p913_p11 = pneg %p912_p5  ;;  %p919_p7 = por %p918_p4, %p917_p9 }
  0x2c   : > { %p920_p10 = pnand %p919_p7, %p913_p11 }
  0x2e   : > { %923 = shalt.err (!%p920_p10)
}
  0x2f   : > { %s1348_s21 = smov 128   ;;  %s1044_s25 = smov 8  }
  0x30   : > { %821 = dma.hbm_to_vmem [thread:$0]  (!%p1166_p0), %s1158_s10, 256, %s1162_s12, %s192_s14, %s1348_s21, %s1348_s21, %s1044_s25  }
  0x31   : > { %p254_p9 = scmp.lt.s32.totalorder %s1040_s20, 3  ;;  %s1208_s9 = scalar_lea.hbm %s1343_s1, %s796_s7 }
  0x32   : > { %p1355_p11 = scmp.ge.s32.totalorder %s1040_s20, 1  ;;  %s218_s22 = scalar_lea.vmem [#allocation5], %s774_s6 }
  0x33   : > { %s227_s24 = sshll.u32 %s218_s22, 4  ;;  %s215_s10 = scalar_lea.sflag [#allocation6], %s1149_s5  ;;  %s1218_s24 = int_to_ptr.vmem [resolvable:$true] %s227_s24 }
  0x34   : > { %p1212_p12 = pnand %p1355_p11, %p254_p9  ;;  %s924_s12 = scalar_lea.hbm %s1208_s9, 256 }
  0x35   : > { %p925_p1 = scmp.ne.s32.totalorder %s1208_s9, %s924_s12  ;;  %s929_s26 = scalar_lea.hbm %s1343_s1, 512 }
  0x36   : > { %p930_p2 = scmp.lt.u32.totalorder %s1208_s9, %s1343_s1  ;;  %p931_p5 = scmp.lt.u32.totalorder %s929_s26, %s924_s12 }
  0x37   : > { %p927_p6 = pnand %p925_p1, %p896_p3  ;;  %p933_p7 = scmp.lt.u32.totalorder %s924_s12, %s1208_s9 }
  0x38   : > { %p932_p4 = por %p931_p5, %p930_p2 }
  0x39   : > { %p928_p13 = pneg %p927_p6 }
  0x3a   : > { %p934_p10 = por %p933_p7, %p932_p4 }
  0x3c   : > { %p935_p9 = pnand %p934_p10, %p928_p13 }
  0x3e   : > { %938 = shalt.err (!%p935_p9)
}
  0x3f   : > { %s939_s6 = scalar_lea.vmem %s1218_s24, 256  ;;  %s1045_s22 = smov [#allocation5]  }
  0x40   : > { %p940_p11 = scmp.ne.s32.totalorder %s1218_s24, %s939_s6  ;;  %s944_s7 = sshll.u32 %s1045_s22, 4  ;;  %s945_s7 = int_to_ptr.vmem [resolvable:$false] %s944_s7 }
  0x41   : > { %s946_s21 = scalar_lea.vmem %s945_s7, 512  ;;  %p947_p8 = scmp.lt.s32.totalorder %s1218_s24, %s945_s7 }
  0x42   : > { %p942_p1 = pnand %p940_p11, %p896_p3  ;;  %p948_p2 = scmp.lt.s32.totalorder %s946_s21, %s939_s6 }
  0x44   : > { %p943_p6 = pneg %p942_p1  ;;  %p949_p5 = por %p948_p2, %p947_p8 }
  0x46   : > { %p950_p4 = pnand %p949_p5, %p943_p6 }
  0x48   : > { %953 = shalt.err (!%p950_p4)
}
  0x49   : > { %s1357_s12 = smov 128   ;;  %258 = sbr.rel (%p1212_p12) target bundleno = 454 (0x1c6), region = 36 }
  0x4a   : > { %824 = dma.hbm_to_vmem [thread:$0]  (!%p1166_p0), %s1208_s9, 256, %s1218_s24, %s215_s10, %s1357_s12, %s1357_s12, %s1044_s25  }
  0x4b   : > { %s1252_s14 = sand.u32 (!%p1212_p12), 1, %s1024_s16   ;;  %p1358_p8 = scmp.ne.s32.totalorder (!%p1212_p12), %s1351_s27, 0 }
  0x4c   : > { %s781_s26 = sshll.u32 (!%p1212_p12), %s1252_s14, 4  ;;  %s261_s8 = scalar_lea.sflag (!%p1212_p12), [#allocation3], %s1252_s14 }
  0x4d   : > { %s264_s13 = scalar_lea.vmem (!%p1212_p12), [#allocation2], %s781_s26 }
  0x50   : > { %1007 = dma.done.wait (%p1358_p8), %s261_s8, 256  }
  0x51   : > { %1009 = vsyncadd (%p1358_p8), %s261_s8, 4294967040  ;;  %s270_s5 = scalar_lea.sflag [#allocation6], %s1252_s14  ;;  %s273_s25 = scalar_lea.vmem [#allocation5], %s781_s26 }
  0x52   : > { %1011 = dma.done.wait (%p1358_p8), %s270_s5, 256  }
  0x53   : > { %1013 = vsyncadd (%p1358_p8), %s270_s5, 4294967040  ;;  %p317_p0 = scmp.lt.s32.totalorder %s1032_s18, 1  ;;  %v1046_v0 = vmov 0.0   ;;  %vm1047_vm0 = vmmov 0   ;;  %v1048_v1 = vmov 0   ;;  %vm334_vm1 = vcmask 261120  }
  0x54   : > { %802 = vmatprep.subr.mxu0 %v1046_v0  ;;  %807 = vmatprep.subr.mxu1 %v1046_v0  ;;  %v332_v2 = vld [vmem:[%s273_s25] sm:$0xff]  ;;  %v333_v3 = vld [vmem:[%s273_s25 + $0x8] sm:$0xff]  ;;  %v1049_v7 = vmov 1983009808   ;;  %v515_v9 = vlaneseq  ;;  %v1050_v10 = vmov 1934713408  }
  0x55   : > { %804 = vmatprep.mubr.msk.f32.mxu0 %vm1047_vm0, %v1046_v0  ;;  %809 = vmatprep.mubr.msk.f32.mxu1 %vm1047_vm0, %v1046_v0  ;;  %s318_s9 = scalar_select %p317_p0, %s1032_s18, 1  ;;  %v330_v4 = vld [vmem:[%s264_s13] sm:$0xff]  ;;  %v331_v5 = vld [vmem:[%s264_s13 + $0x8] sm:$0xff]  ;;  %v513_v8 = vunpack.c.l.s4 %v1049_v7  ;;  %v544_v11 = vunpack.c.l.s4 %v1050_v10  ;;  %vm605_vm2 = vcmask 64512   ;;  %vm607_vm3 = vcmask 130048  }
  0x56   : > { %893 = vset.pattern.permute.xlu0 %v1048_v1  ;;  %803 = vmatpush3.xpose.msk.msra.mxu0 %vm334_vm1, %v332_v2  ;;  %v516_v13 = vshrl.u32 %v515_v9, 7  ;;  %s1051_s12 = smov 16   ;;  %s1052_s26 = smov 8   ;;  %vm609_vm4 = vcmask 195584   ;;  %vm612_vm5 = vcmask 326656   ;;  %vm614_vm6 = vcmask 392192  }
  0x57   : > { %s784_s11 = sshll.u32 %s318_s9, 3  ;;  %808 = vmatpush3.xpose.msk.msra.mxu1 %vm334_vm1, %v333_v3  ;;  %s785_s6 = sshll.u32 %s318_s9, 1  ;;  %v514_v12 = vunpack.c.0.s8 %v513_v8  ;;  %v545_v19 = vunpack.c.0.s8 %v544_v11  ;;  %vm616_vm7 = vcmask 457728   ;;  %vm618_vm8 = vcmask 517120  }
  0x58   : > { %s320_s10 = scalar_lea.vmem %s1344_s2, %s784_s11  ;;  %s328_s21 = scalar_lea.vmem %s1345_s3, %s785_s6 }
  0x59   : > { %v487_v6 = vld [vmem:[%s320_s10] sm:$0xff]  ;;  %805 = vmatmul.mubr.msk.f32.vlgmr.msra.gmra.mrb[0].mxu0 %vm334_vm1, %v330_v4  ;;  %v517_v21 = vsub.s32 %v514_v12, %v516_v13  ;;  %v548_v27 = vsub.s32 %v545_v19, %v516_v13  ;;  %s1053_s8 = smov 24   ;;  %s1054_s13 = smov 32  }
  0x5a   : > { %490 = vperm.xlu0 %893, %v487_v6   ;;  %810 = vmatmul.mubr.msk.f32.vlgmr.msra.gmra.mrb[0].mxu1 %vm334_vm1, %v331_v5  ;;  %v790_v16 = vld [vmem:[%s328_s21] ss:$0 sm:$0xff]  ;;  %v791_v18 = vld [vmem:[%s328_s21 + $0x1] ss:$0 sm:$0xff]  ;;  %s1055_s5 = smov 40   ;;  %s1056_s25 = smov 48  }
  0x5b   : > { %s1057_s9 = smov 56   ;;  %s783_s11 = sshll.u32 %s1252_s14, 1 }
  0x5c   : > { %s793_s27 = sshll.u32 %s1032_s18, 5  ;;  %s314_s24 = scalar_lea.vmem [#allocation7], %s783_s11 }
  0x5d   : > { %s635_s10 = sshll.u32 %s314_s24, 4  ;;  %s1293_s7 = scalar_lea.hbm %s1346_s4, %s793_s27  ;;  %s1295_s10 = int_to_ptr.vmem [resolvable:$true] %s635_s10 }
  0x5e   : > { %s621_s18 = scalar_lea.sflag [#allocation4], %s1252_s14  ;;  %s954_s21 = scalar_lea.vmem %s1295_s10, 32 }
  0x5f   : > { %p955_p3 = scmp.ne.s32.totalorder %s1295_s10, %s954_s21  ;;  %p1359_p12 = scmp.ne.s32.totalorder %s1352_s28, 0 }
  0x61   : > { %p956_p13 = pnand %p955_p3, %p1359_p12 }
  0x63   : > { %p957_p7 = pneg %p956_p13 }
  0xd9   : > { %v491_v14 = vpop.permute.xlu0 %490 }
 0x12c   : > { %v407_v15 = vpop.f32.mrb[0].mxu0 }
 0x12d   : > { %v483_v17 = vpop.f32.mrb[0].mxu1  ;;  %v493_v20 = vmul.f32 %v491_v14, %v407_v15  ;;  %v806_v23 = vpop.f32.mrb[1].mxu0 }
 0x12e   : > { %v494_v22 = vmul.f32 %v491_v14, %v483_v17  ;;  %v811_v24 = vpop.f32.mrb[1].mxu1 }
 0x12f   : > { %v509_v25 = vmul.f32 %v790_v16, %v493_v20 }
 0x130   : > { %v510_v26 = vmul.f32 %v791_v18, %v494_v22 }
 0x131   : > { %v511_v28 = vcombine.high %v509_v25, %v1046_v0  ;;  %v518_v29 = vrot.slane %v509_v25, %v517_v21 }
 0x132   : > { %v526_v30 = vcombine.high %v510_v26, %v1046_v0  ;;  %v533_v31 = vrot.slane %v510_v26, %v517_v21 }
 0x133   : > { %v525_v32 = vrot.slane %v511_v28, %v517_v21 }
 0x134   : > { %v540_v33 = vrot.slane %v526_v30, %v517_v21  ;;  %v541_v34 = vcombine.low %v518_v29, %v533_v31  ;;  %v542_v35 = vcombine.high %v518_v29, %v533_v31 }
 0x136   : > { %v556_v36 = vrot.slane %v542_v35, %v548_v27  ;;  %v549_v37 = vrot.slane %v541_v34, %v548_v27  ;;  %v557_v38 = vcombine.low %v525_v32, %v540_v33  ;;  %v558_v39 = vcombine.high %v525_v32, %v540_v33 }
 0x138   : > { %582 = vrot.lane.b32.xlu1 %v556_v36, %s1051_s12  ;;  %v573_v40 = vcombine.high %v549_v37, %v1046_v0  ;;  %v574_v41 = vcombine.high %v556_v36, %v1046_v0  ;;  %v565_v42 = vrot.slane %v557_v38, %v548_v27  ;;  %v572_v44 = vrot.slane %v558_v39, %v548_v27  ;;  %s1058_s12 = smov [#allocation7]  }
 0x13a   : > { %578 = vrot.lane.b32.xlu0 %v573_v40, %s1052_s26  ;;  %v575_v43 = vcombine.high %v565_v42, %v1046_v0  ;;  %v576_v45 = vcombine.high %v572_v44, %v1046_v0  ;;  %s958_s26 = sshll.u32 %s1058_s12, 4  ;;  %s959_s26 = int_to_ptr.vmem [resolvable:$false] %s958_s26 }
 0x13b   : > { %p961_p10 = scmp.lt.s32.totalorder %s1295_s10, %s959_s26 }
 0x13c   : > { %586 = vrot.lane.b32.xlu1 %v574_v41, %s1053_s8  ;;  %s960_s8 = scalar_lea.vmem %s959_s26, 64 }
 0x13d   : > { %p962_p9 = scmp.lt.s32.totalorder %s960_s8, %s954_s21 }
 0x13e   : > { %590 = vrot.lane.b32.xlu0 %v565_v42, %s1054_s13 }
 0x13f   : > { %p963_p11 = por %p962_p9, %p961_p10 }
 0x140   : > { %594 = vrot.lane.b32.xlu1 %v575_v43, %s1055_s5 }
 0x141   : > { %p964_p1 = pnand %p963_p11, %p957_p7 }
 0x142   : > { %598 = vrot.lane.b32.xlu0 %v572_v44, %s1056_s25 }
 0x144   : > { %602 = vrot.lane.b32.xlu1 %v576_v45, %s1057_s9 }
 0x1aa   : > { %v583_v46 = vpop.permute.xlu1 %582 }
 0x1ac   : > { %v579_v47 = vpop.permute.xlu0 %578 }
 0x1ad   : > { %v606_v48 = vsel %vm605_vm2, %v549_v37, %v579_v47 }
 0x1ae   : > { %v587_v49 = vpop.permute.xlu1 %586  ;;  %v608_v50 = vsel %vm607_vm3, %v606_v48, %v583_v46 }
 0x1af   : > { %v610_v51 = vsel %vm609_vm4, %v608_v50, %v587_v49 }
 0x1b0   : > { %v591_v52 = vpop.permute.xlu0 %590 }
 0x1b1   : > { %v611_v53 = vsel %vm334_vm1, %v610_v51, %v591_v52 }
 0x1b2   : > { %v595_v54 = vpop.permute.xlu1 %594 }
 0x1b3   : > { %v613_v55 = vsel %vm612_vm5, %v611_v53, %v595_v54 }
 0x1b4   : > { %v599_v56 = vpop.permute.xlu0 %598 }
 0x1b5   : > { %v615_v57 = vsel %vm614_vm6, %v613_v55, %v599_v56 }
 0x1b6   : > { %v603_v58 = vpop.permute.xlu1 %602 }
 0x1b7   : > { %v617_v59 = vsel %vm616_vm7, %v615_v57, %v603_v58 }
 0x1b8   : > { %619 = vst.msk [vmem:[%s314_s24] sm:$0x3] %vm618_vm8, %v617_v59 }
 0x1b9   : > { %967 = shalt.err (!%p964_p1)
}
 0x1ba   : > { %s968_s14 = scalar_lea.hbm %s1293_s7, 32  ;;  %s972_s25 = scalar_lea.hbm %s1346_s4, 64 }
 0x1bb   : > { %p969_p6 = scmp.ne.s32.totalorder %s1293_s7, %s968_s14  ;;  %p973_p4 = scmp.lt.u32.totalorder %s1293_s7, %s1346_s4 }
 0x1bc   : > { %p974_p8 = scmp.lt.u32.totalorder %s972_s25, %s968_s14  ;;  %p976_p3 = scmp.lt.u32.totalorder %s968_s14, %s1293_s7 }
 0x1bd   : > { %p970_p2 = pnand %p969_p6, %p1359_p12 }
 0x1be   : > { %p975_p0 = por %p974_p8, %p973_p4 }
 0x1bf   : > { %p971_p5 = pneg %p970_p2 }
 0x1c0   : > { %p977_p13 = por %p976_p3, %p975_p0 }
 0x1c2   : > { %p978_p7 = pnand %p977_p13, %p971_p5 }
 0x1c4   : > { %981 = shalt.err (!%p978_p7)
}
 0x1c5   : > { %816 = dma.vmem_to_hbm [thread:$0]  (%p1359_p12), %s1295_s10, 32, %s1293_s7, %s621_s18  }
 0x1c6 PF: > { %s647_s27 = sand.u32 1, %s1020_s15   ;;  %p1360_p10 = scmp.ne.s32.totalorder %s1353_s30, 0 }
 0x1c7   : > { %p1361_p9 = scmp.ge.s32.totalorder %s1040_s20, 2  ;;  %s648_s24 = scalar_lea.sflag [#allocation4], %s647_s27 }
 0x1c9   : > { %p826_p11 = pnand %p1361_p9, %p1360_p10 }
 0x1cb   : > { %1015 = dma.done.wait (!%p826_p11), %s648_s24, 32  }
 0x1cc   : > { %1017 = vsyncadd (!%p826_p11), %s648_s24, 4294967264  ;;  %s23_s20 = sadd.s32 1, %s1040_s20   ;;  %s1362_s15 = smov %s1024_s16 }
 0x1cd   : > { %p20_p1 = scmp.ge.s32.totalorder %s23_s20, 4   ;;  %s1363_s16 = smov %s1028_s17 }
 0x1ce   : > { %s1364_s17 = smov %s1140_s29  ;;  %s1365_s18 = smov %s1036_s19 }
 0x1cf   : > { %s1366_s19 = smov %s1368_s23  ;;  %22 = sbr.rel (!%p20_p1) target bundleno = 8 (0x8), region = 100 }
 0x1d6   :  { %653 = vsyncpa [#allocation3], 1 }
 0x1d7   :  { %655 = vsyncpa [#allocation3 + $0x1], 1 }
 0x1d8   :  { %656 = vsyncpa [#allocation6], 1 }
 0x1d9   :  { %658 = vsyncpa [#allocation6 + $0x1], 1 }
 0x1da   :  { %659 = vsyncpa [#allocation4], 1 }
 0x1db   :  { %661 = vsyncpa [#allocation4 + $0x1], 1 }

</bundles_post_ra>
